<compile_context>
chip_gen: v6e
topology: v6e:2x2x1
jax: 0.10.0
libtpu: 0.0.40
codegen_flags: <defaults>
</compile_context>

<pallas_src>
import functools

import jax
import jax.numpy as jnp
from jax.experimental import pallas as pl
from jax.experimental.pallas import tpu as pltpu


# ---------------------------------------------------------------------------
# Generation-aware sizing (v5e/v6e: 128 MiB physical VMEM, v7x: 64 MiB)
# ---------------------------------------------------------------------------
def _vmem_limit_bytes():
    try:
        cap = int(pltpu.get_tpu_info().vmem_capacity_bytes)
    except Exception:
        cap = 64 * 1024 * 1024                       # conservative default
    if cap >= 100 * 1024 * 1024:                     # v5e / v6e (128 MiB)
        return 64 * 1024 * 1024
    return 48 * 1024 * 1024                          # v7x (64 MiB): leave Mosaic headroom


def _sublane_align(dtype):
    # 8 for f32, 16 for bf16, 32 for int8/fp8 (sub-32-bit packs along sublanes).
    return max(8, 32 // jnp.dtype(dtype).itemsize)


# ---------------------------------------------------------------------------
# Fused single-pass kernel: one grid step == one full channel in VMEM
# ---------------------------------------------------------------------------
def _fused_kernel(x_ref, w_ref, b_ref, rm_ref, rs_ref, y_ref, stats_ref,
                  *, inv_count, eps, use_running):
    c = pl.program_id(0)

    x = x_ref[...].astype(jnp.float32)               # (N, H*W): whole channel
    mean = jnp.sum(x) * inv_count
    xc = x - mean
    var = jnp.sum(xc * xc) * inv_count               # centered: no cancellation
    std = jnp.sqrt(var + eps)

    w = w_ref[c]
    b = b_ref[c]
    if use_running:                                  # static Python branch
        rs = rs_ref[c]
        rm = rm_ref[c]
        r = std / rs
        d = (mean - rm) / rs
        scale = w * r / std
        shift = d * w + b
    else:                                            # first call: r = 1, d = 0
        scale = w / std
        shift = b

    # y = ((x - mean)/std * r + d) * w + b  ==  xc * scale + shift
    y_ref[...] = (xc * scale + shift).astype(y_ref.dtype)

    # Emit (mean, std) for the running-stat bookkeeping: row 0 = mean, row 1 = std.
    row = jax.lax.broadcasted_iota(jnp.int32, stats_ref.shape, 1)
    stats_ref[...] = jnp.where(row == 0, mean, std)


def _fused_forward(x2, weight, bias, rmean, rstd, *, hw, eps, use_running, vmem_limit):
    N, CHW = x2.shape
    C = CHW // hw
    kern = functools.partial(
        _fused_kernel,
        inv_count=1.0 / float(N * hw),
        eps=float(eps),
        use_running=use_running,
    )
    smem = pl.BlockSpec(memory_space=pltpu.MemorySpace.SMEM)
    y2, stats = pl.pallas_call(
        kern,
        out_shape=(jax.ShapeDtypeStruct((N, CHW), x2.dtype),
                   jax.ShapeDtypeStruct((C, 8, 128), jnp.float32)),
        grid_spec=pltpu.PrefetchScalarGridSpec(
            num_scalar_prefetch=0,
            grid=(C,),
            in_specs=[pl.BlockSpec((N, hw), lambda c: (0, c)),   # one channel slab
                      smem, smem, smem, smem],                   # w, b, rm, rs
            out_specs=[pl.BlockSpec((N, hw), lambda c: (0, c)),
                       pl.BlockSpec((1, 8, 128), lambda c: (c, 0, 0))],
        ),
        compiler_params=pltpu.CompilerParams(
            dimension_semantics=("parallel",),
            vmem_limit_bytes=vmem_limit),
    )(x2, weight, bias, rmean, rstd)
    return y2, stats


# ---------------------------------------------------------------------------
# Two-pass fallback: tile selection helpers
# ---------------------------------------------------------------------------
def _pick_tile(dim, align, cap):
    """Largest t <= cap with t % align == 0 and dim % t == 0; else the full dim."""
    if dim <= cap:
        return dim
    t = (cap // align) * align
    while t >= align:
        if dim % t == 0:
            return t
        t -= align
    # TODO(synk): masked ragged tail (pl.cdiv grid + pl.when) instead of full-dim fallback.
    return dim


def _choose_tiles(R, L, dtype, vmem_limit):
    # ~4 live blocks (in/out double-buffered) + headroom, counted in f32 elements.
    max_block_elems = max(8 * 128, vmem_limit // 16 // 4)
    align_r = _sublane_align(dtype)
    tl = _pick_tile(L, 128, max(128, max_block_elems // 8))
    row_cap = max(align_r, max_block_elems // max(tl, 1))
    tr = _pick_tile(R, align_r, row_cap)
    # Megacore (v7x): try to keep >= 2 steps on the parallel row axis.
    if R // tr < 2:
        tr2 = _pick_tile(R, align_r, max(align_r, R // 2))
        if tr2 < R and R % tr2 == 0:
            tr = tr2
    return tr, tl


# ---------------------------------------------------------------------------
# Two-pass fallback kernels
# ---------------------------------------------------------------------------
def _stats_kernel(x_ref, out_ref):
    """Per-row [sum, sumsq] over the lane (H*W) axis, accumulated in the resident output."""
    @pl.when(pl.program_id(1) == 0)
    def _():
        out_ref[...] = jnp.zeros_like(out_ref)

    x = x_ref[...].astype(jnp.float32)
    out_ref[:, 0:1] += jnp.sum(x, axis=1, keepdims=True)
    out_ref[:, 1:2] += jnp.sum(x * x, axis=1, keepdims=True)


def _norm_kernel(x_ref, p_ref, y_ref):
    """y = x * scale + shift, with per-row scale/shift broadcast along lanes."""
    x = x_ref[...].astype(jnp.float32)
    y_ref[...] = (x * p_ref[:, 0:1] + p_ref[:, 1:2]).astype(y_ref.dtype)


def _row_sums(x2d, tr, tl, vmem_limit):
    R, L = x2d.shape
    return pl.pallas_call(
        _stats_kernel,
        out_shape=jax.ShapeDtypeStruct((R, 2), jnp.float32),
        grid_spec=pltpu.PrefetchScalarGridSpec(
            num_scalar_prefetch=0,
            grid=(R // tr, L // tl),
            in_specs=[pl.BlockSpec((tr, tl), lambda i, j: (i, j))],
            out_specs=pl.BlockSpec((tr, 2), lambda i, j: (i, 0)),
        ),
        compiler_params=pltpu.CompilerParams(
            dimension_semantics=("parallel", "arbitrary"),
            vmem_limit_bytes=vmem_limit),
    )(x2d)


def _normalize(x2d, params, tr, tl, vmem_limit):
    R, L = x2d.shape
    return pl.pallas_call(
        _norm_kernel,
        out_shape=jax.ShapeDtypeStruct((R, L), x2d.dtype),
        grid_spec=pltpu.PrefetchScalarGridSpec(
            num_scalar_prefetch=0,
            grid=(R // tr, L // tl),
            in_specs=[pl.BlockSpec((tr, tl), lambda i, j: (i, j)),
                      pl.BlockSpec((tr, 2), lambda i, j: (i, 0))],
            out_specs=pl.BlockSpec((tr, tl), lambda i, j: (i, j)),
        ),
        compiler_params=pltpu.CompilerParams(
            dimension_semantics=("parallel", "parallel"),
            vmem_limit_bytes=vmem_limit),
    )(x2d, params)


# ---------------------------------------------------------------------------
# TBR forward (functional: state passed in / returned)
# ---------------------------------------------------------------------------
def tbr_forward(x, weight, bias, running_mean=None, running_std=None,
                prior=0.9, eps=1e-5):
    """Equivalent of TBR.forward. x is NCHW. Returns (y, new_running_mean, new_running_std)."""
    N, C, H, W = x.shape
    HW = H * W
    use_running = running_mean is not None
    vmem_limit = _vmem_limit_bytes()

    w32 = weight.astype(jnp.float32)
    b32 = bias.astype(jnp.float32)
    rm32 = running_mean.astype(jnp.float32) if use_running else jnp.zeros((C,), jnp.float32)
    rs32 = running_std.astype(jnp.float32) if use_running else jnp.ones((C,), jnp.float32)

    # Fused single-pass path: one grid step = one full channel (all N samples) in VMEM.
    align = _sublane_align(x.dtype)
    n_pad = -(-N // align) * align
    fused_bytes = 7 * n_pad * HW * 4              # in/out double-buffered + f32 temps
    lane_ok = (HW % 128 == 0) or (C == 1)

    if lane_ok and fused_bytes <= (vmem_limit * 3) // 4:
        x2 = x.reshape(N, C * HW)                 # free view (NCHW is contiguous)
        y2, stats = _fused_forward(x2, w32, b32, rm32, rs32, hw=HW, eps=eps,
                                   use_running=use_running, vmem_limit=vmem_limit)
        y = y2.reshape(N, C, H, W)
        batch_mean = stats[:, 0, 0]
        batch_std = stats[:, 1, 0]
    else:
        # ----- two-pass fallback -----
        R = N * C
        x2d = x.reshape(R, HW)
        tr, tl = _choose_tiles(R, HW, x.dtype, vmem_limit)

        sums = _row_sums(x2d, tr, tl, vmem_limit)                 # (R, 2)
        count = float(N * HW)
        ch_sum = sums[:, 0].reshape(N, C).sum(axis=0)
        ch_sq = sums[:, 1].reshape(N, C).sum(axis=0)
        batch_mean = ch_sum / count
        # TODO(synk): shifted sum-of-squares to avoid E[x^2]-E[x]^2 cancellation.
        batch_var = jnp.maximum(ch_sq / count - batch_mean * batch_mean, 0.0)
        batch_std = jnp.sqrt(batch_var + eps)

        rm_eff = rm32 if use_running else batch_mean              # first call: r=1, d=0
        rs_eff = rs32 if use_running else batch_std
        r = batch_std / rs_eff
        d = (batch_mean - rm_eff) / rs_eff

        # Fold ((x - mean)/std * r + d) * w + b  into  x * scale + shift (per channel).
        scale = w32 * r / batch_std
        shift = (d - batch_mean * r / batch_std) * w32 + b32
        params = jnp.stack([jnp.tile(scale, N), jnp.tile(shift, N)], axis=1)  # (R, 2)

        y = _normalize(x2d, params, tr, tl, vmem_limit).reshape(N, C, H, W)

    # Running-stat bookkeeping (module "state"), functional.
    rm_old = rm32 if use_running else batch_mean
    rs_old = rs32 if use_running else batch_std
    new_rm = prior * rm_old + (1.0 - prior) * batch_mean
    new_rs = prior * rs_old + (1.0 - prior) * batch_std
    return y, new_rm, new_rs


# ---------------------------------------------------------------------------
# Pure-JAX reference (mirrors the PyTorch module)
# ---------------------------------------------------------------------------
def tbr_reference(x, weight, bias, running_mean=None, running_std=None,
                  prior=0.9, eps=1e-5):
    batch_mean = x.mean(axis=(0, 2, 3))
    batch_std = jnp.sqrt(x.var(axis=(0, 2, 3)) + eps)
    if running_mean is None:
        running_mean = batch_mean
        running_std = batch_std
    r = batch_std / running_std
    d = (batch_mean - running_mean) / running_std
    xn = ((x - batch_mean[None, :, None, None]) / batch_std[None, :, None, None]
          * r[None, :, None, None] + d[None, :, None, None])
    y = xn * weight[None, :, None, None] + bias[None, :, None, None]
    new_rm = prior * running_mean + (1.0 - prior) * batch_mean
    new_rs = prior * running_std + (1.0 - prior) * batch_std
    return y, new_rm, new_rs


if __name__ == "__main__":
    key = jax.random.PRNGKey(0)
    k1, k2, k3, kw, kb = jax.random.split(key, 5)
    prior, eps = 0.9, 1e-5

    # ---- shape that takes the fused single-pass path (H*W % 128 == 0) ----
    N, C, H, W = 2, 4, 16, 16
    x1 = jax.random.normal(k1, (N, C, H, W), dtype=jnp.float32) * 2.0 + 0.5
    x2 = jax.random.normal(k2, (N, C, H, W), dtype=jnp.float32) * 1.3 - 0.2
    weight = jax.random.normal(kw, (C,), dtype=jnp.float32) + 1.0   # BN gamma
    bias = jax.random.normal(kb, (C,), dtype=jnp.float32) * 0.1     # BN beta

    # First forward: running stats are None (initialized from the batch).
    y1, rm, rs = tbr_forward(x1, weight, bias, None, None, prior, eps)
    # Second forward: exercises nontrivial r and d (stateful path).
    y2, rm2, rs2 = tbr_forward(x2, weight, bias, rm, rs, prior, eps)
    jax.block_until_ready((y1, y2, rm2, rs2))

    ry1, rrm, rrs = tbr_reference(x1, weight, bias, None, None, prior, eps)
    ry2, rrm2, rrs2 = tbr_reference(x2, weight, bias, rrm, rrs, prior, eps)
    assert jnp.allclose(y1, ry1, atol=1e-4, rtol=1e-4)
    assert jnp.allclose(y2, ry2, atol=1e-4, rtol=1e-4)
    assert jnp.allclose(rm2, rrm2, atol=1e-5, rtol=1e-5)
    assert jnp.allclose(rs2, rrs2, atol=1e-5, rtol=1e-5)

    # ---- shape that takes the two-pass fallback path (H*W % 128 != 0) ----
    Nf, Cf, Hf, Wf = 2, 4, 5, 5
    x3 = jax.random.normal(k3, (Nf, Cf, Hf, Wf), dtype=jnp.float32) * 0.7 + 1.0
    y3, rm3, rs3 = tbr_forward(x3, weight, bias, None, None, prior, eps)
    jax.block_until_ready((y3, rm3, rs3))
    ry3, rrm3, rrs3 = tbr_reference(x3, weight, bias, None, None, prior, eps)
    assert jnp.allclose(y3, ry3, atol=1e-4, rtol=1e-4)
    assert jnp.allclose(rm3, rrm3, atol=1e-5, rtol=1e-5)
    assert jnp.allclose(rs3, rrs3, atol=1e-5, rtol=1e-5)

    print("KERNEL_OK")
</pallas_src>

<mosaic_0001>
module attributes {stable_mosaic.version = 11 : i64} {
  func.func @_fused_kernel(%arg0: i32, %arg1: memref<2x256xf32, #tpu.memory_space<vmem>>, %arg2: memref<4xf32, #tpu.memory_space<smem>>, %arg3: memref<4xf32, #tpu.memory_space<smem>>, %arg4: memref<4xf32, #tpu.memory_space<smem>>, %arg5: memref<4xf32, #tpu.memory_space<smem>>, %arg6: memref<2x256xf32, #tpu.memory_space<vmem>>, %arg7: memref<1x8x128xf32, #tpu.memory_space<vmem>>) attributes {dimension_semantics = [#tpu.dimension_semantics<parallel>], iteration_bounds = array<i64: 4>, scalar_prefetch = 0 : i64, scratch_operands = 0 : i64, tpu.core_type = #tpu.core_type<tc>, window_params = [{transform_indices = @transform_0, window_bounds = array<i64: 2, 256>}, {transform_indices = @transform_1, window_bounds = array<i64: 4>}, {transform_indices = @transform_2, window_bounds = array<i64: 4>}, {transform_indices = @transform_3, window_bounds = array<i64: 4>}, {transform_indices = @transform_4, window_bounds = array<i64: 4>}, {transform_indices = @transform_5, window_bounds = array<i64: 2, 256>}, {transform_indices = @transform_6, window_bounds = array<i64: 1, 8, 128>}]} {
    %c0 = arith.constant 0 : index
    %c0_0 = arith.constant 0 : index
    %0 = vector.load %arg1[%c0, %c0_0] : memref<2x256xf32, #tpu.memory_space<vmem>>, vector<2x256xf32>
    %1 = vector.shape_cast %0 : vector<2x256xf32> to vector<1x2x256xf32>
    %cst = arith.constant dense<0.000000e+00> : vector<1xf32>
    %2 = vector.multi_reduction <add>, %1, %cst [1, 2] : vector<1x2x256xf32> to vector<1xf32>
    %3 = vector.shape_cast %2 : vector<1xf32> to vector<1x1x1xf32>
    %4 = vector.extract %3[0, 0, 0] : f32 from vector<1x1x1xf32>
    %cst_1 = arith.constant 0.001953125 : f32
    %5 = arith.mulf %4, %cst_1 : f32
    %6 = vector.broadcast %5 : f32 to vector<2x256xf32>
    %7 = arith.subf %0, %6 : vector<2x256xf32>
    %8 = arith.mulf %7, %7 : vector<2x256xf32>
    %9 = vector.shape_cast %8 : vector<2x256xf32> to vector<1x2x256xf32>
    %cst_2 = arith.constant dense<0.000000e+00> : vector<1xf32>
    %10 = vector.multi_reduction <add>, %9, %cst_2 [1, 2] : vector<1x2x256xf32> to vector<1xf32>
    %11 = vector.shape_cast %10 : vector<1xf32> to vector<1x1x1xf32>
    %12 = vector.extract %11[0, 0, 0] : f32 from vector<1x1x1xf32>
    %cst_3 = arith.constant 0.001953125 : f32
    %13 = arith.mulf %12, %cst_3 : f32
    %cst_4 = arith.constant 9.99999974E-6 : f32
    %14 = arith.addf %13, %cst_4 : f32
    %15 = math.sqrt %14 : f32
    %16 = arith.index_cast %arg0 : i32 to index
    %17 = memref.load %arg2[%16] : memref<4xf32, #tpu.memory_space<smem>>
    %18 = arith.index_cast %arg0 : i32 to index
    %19 = memref.load %arg3[%18] : memref<4xf32, #tpu.memory_space<smem>>
    %20 = arith.divf %17, %15 : f32
    %21 = vector.broadcast %20 : f32 to vector<2x256xf32>
    %22 = arith.mulf %7, %21 : vector<2x256xf32>
    %23 = vector.broadcast %19 : f32 to vector<2x256xf32>
    %24 = arith.addf %22, %23 : vector<2x256xf32>
    %c0_5 = arith.constant 0 : index
    %c0_6 = arith.constant 0 : index
    %25 = vector.load %arg6[%c0_5, %c0_6] : memref<2x256xf32, #tpu.memory_space<vmem>>, vector<2x256xf32>
    tpu.vector_store %arg6[%c0_5, %c0_6], %24 {strides = array<i32>} : memref<2x256xf32, #tpu.memory_space<vmem>>, vector<2x256xf32>,
    %26 = tpu.iota {dimensions = array<i32: 1>} : vector<1x8x128xi32>
    %c0_i32 = arith.constant 0 : i32
    %27 = vector.broadcast %c0_i32 : i32 to vector<1x8x128xi32>
    %28 = arith.cmpi eq, %26, %27 : vector<1x8x128xi32>
    %29 = vector.broadcast %5 : f32 to vector<1x8x128xf32>
    %30 = vector.broadcast %15 : f32 to vector<1x8x128xf32>
    %31 = arith.select %28, %29, %30 : vector<1x8x128xi1>, vector<1x8x128xf32>
    %c0_7 = arith.constant 0 : index
    %c0_8 = arith.constant 0 : index
    %c0_9 = arith.constant 0 : index
    %32 = vector.load %arg7[%c0_7, %c0_8, %c0_9] : memref<1x8x128xf32, #tpu.memory_space<vmem>>, vector<1x8x128xf32>
    tpu.vector_store %arg7[%c0_7, %c0_8, %c0_9], %31 {strides = array<i32>} : memref<1x8x128xf32, #tpu.memory_space<vmem>>, vector<1x8x128xf32>,
    return
  }
  func.func @transform_0(%arg0: i32) -> (i32, i32) {
    %c0_i32 = arith.constant 0 : i32
    %c0_i32_0 = arith.constant 0 : i32
    return %c0_i32, %arg0 : i32, i32
  }
  func.func @transform_1(%arg0: i32) -> i32 {
    %c0_i32 = arith.constant 0 : i32
    %c0_i32_0 = arith.constant 0 : i32
    return %c0_i32 : i32
  }
  func.func @transform_2(%arg0: i32) -> i32 {
    %c0_i32 = arith.constant 0 : i32
    %c0_i32_0 = arith.constant 0 : i32
    return %c0_i32 : i32
  }
  func.func @transform_3(%arg0: i32) -> i32 {
    %c0_i32 = arith.constant 0 : i32
    %c0_i32_0 = arith.constant 0 : i32
    return %c0_i32 : i32
  }
  func.func @transform_4(%arg0: i32) -> i32 {
    %c0_i32 = arith.constant 0 : i32
    %c0_i32_0 = arith.constant 0 : i32
    return %c0_i32 : i32
  }
  func.func @transform_5(%arg0: i32) -> (i32, i32) {
    %c0_i32 = arith.constant 0 : i32
    %c0_i32_0 = arith.constant 0 : i32
    return %c0_i32, %arg0 : i32, i32
  }
  func.func @transform_6(%arg0: i32) -> (i32, i32, i32) {
    %c0_i32 = arith.constant 0 : i32
    %c0_i32_0 = arith.constant 0 : i32
    %c0_i32_1 = arith.constant 0 : i32
    return %arg0, %c0_i32, %c0_i32_0 : i32, i32, i32
  }
}

</mosaic_0001>

<bundles_post_ra>
// kernel: tpu_custom_call.1
= control target key start
LH: loop header
LB: loop body
LE: loop exit
PB: predicated region body
PF: predicated region fallthrough
CT: control target
= control target key end

     0   :  { %s1214_s0 = inlined_call_operand.hbm [shape: f32[2,1024], index: 0, kind: input, shape index: {}]   ;;  %s1215_s1 = inlined_call_operand.vmem [shape: f32[4], index: 1, kind: input, shape index: {}]   ;;  %s1216_s2 = inlined_call_operand.vmem [shape: f32[4], index: 2, kind: input, shape index: {}]   ;;  %s1217_s3 = inlined_call_operand.vmem [shape: f32[4], index: 3, kind: input, shape index: {}]   ;;  %s1218_s4 = inlined_call_operand.vmem [shape: f32[4], index: 4, kind: input, shape index: {}]   ;;  %s1219_s5 = inlined_call_operand.hbm [shape: f32[2,1024], index: 5, kind: output, shape index: {0}]   ;;  %s1220_s6 = inlined_call_operand.hbm [shape: f32[4,8,128], index: 6, kind: output, shape index: {1}]  }
   0x1   :  { %1225 = sst [smem:[#allocation21_spill]] %s1215_s1 }
   0x2   :  { %12 = vsyncpa [#allocation3], 0 }
   0x3   :  { %14 = vsyncpa [#allocation3 + $0x1], 0 }
   0x4   :  { %15 = vsyncpa [#allocation5], 0 }
   0x5   :  { %16 = vsyncpa [#allocation8], 0 }
   0x6   :  { %17 = vsyncpa [#allocation11], 0 }
   0x7   :  { %18 = vsyncpa [#allocation4], 0 }
   0x8   :  { %20 = vsyncpa [#allocation4 + $0x1], 0 }
   0x9   :  { %21 = vsyncpa [#allocation14], 0 }
   0xa   :  { %23 = vsyncpa [#allocation14 + $0x1], 0  ;;  %s960_s21 = smov 0   ;;  %s962_s22 = smov 0  }
   0xb   :  { %s964_s23 = smov 0   ;;  %s966_s24 = smov 0  }
   0xc LB: > { %s220_s27 = sshll.u32 %s1216_s2, 4  ;;  %s984_s28 = sadd.s32 4294967295, %s915_s24   ;;  %s915_s24 = sphi %s966_s24, %s1248_s24   ;;  %s911_s23 = sphi %s964_s23, %s1247_s23   ;;  %s907_s22 = sphi %s962_s22, %s1246_s22   ;;  %s903_s21 = sphi %s960_s21, %s1245_s21   ;;  %s221_s27 = int_to_ptr.vmem [resolvable:$true] %s220_s27 }
   0xd   : > { %p590_p0 = scmp.ge.s32.totalorder %s915_s24, 1  ;;  %p1221_p1 = scmp.eq.s32.totalorder %s984_s28, 0 }
   0xe   : > { %p196_p2 = scmp.lt.s32.totalorder %s915_s24, 5  ;;  %s1227_s1 = sld [smem:[#allocation21_spill]] }
   0xf   : > { %s231_s11 = sshll.u32 %s1217_s3, 4  ;;  %s242_s15 = sshll.u32 %s1218_s4, 4  ;;  %s1007_s11 = int_to_ptr.vmem [resolvable:$true] %s231_s11  ;;  %s1012_s15 = int_to_ptr.vmem [resolvable:$true] %s242_s15 }
  0x10   : > { %p989_p3 = pnand %p590_p0, %p196_p2  ;;  %s721_s16 = scalar_lea.vmem %s221_s27, 16 }
  0x11   : > { %p722_p6 = scmp.ne.s32.totalorder %s221_s27, %s721_s16  ;;  %p729_p10 = scmp.lt.s32.totalorder %s221_s27, %s221_s27 }
  0x12   : > { %s1226_s29 = scalar_select %p989_p3, 1, 0 }
  0x13   : > { %p646_p4 = pneg %p989_p3  ;;  %p730_p11 = scmp.lt.s32.totalorder %s721_s16, %s721_s16 }
  0x14   : > { %s209_s8 = sshll.u32 %s1227_s1, 4  ;;  %s210_s8 = int_to_ptr.vmem [resolvable:$true] %s209_s8 }
  0x15   : > { %p1003_p5 = pnand %p646_p4, %p1221_p1  ;;  %p731_p12 = por %p730_p11, %p729_p10 }
  0x17   : > { %p723_p7 = pneg %p1003_p5 }
  0x19   : > { %p724_p8 = pnand %p723_p7, %p722_p6 }
  0x1b   : > { %p725_p9 = pneg %p724_p8 }
  0x1d   : > { %p732_p13 = pnand %p731_p12, %p725_p9 }
  0x1f   : > { %735 = shalt.err (!%p732_p13)
}
  0x20   : > { %s917_s17 = smov [#allocation7]   ;;  %s736_s18 = scalar_lea.vmem %s210_s8, 16 }
  0x21   : > { %652 = dma.vmem_to_smem (!%p1003_p5), %s221_s27, 16, %s917_s17, [#allocation8]  }
  0x22   : > { %p737_p0 = scmp.ne.s32.totalorder %s210_s8, %s736_s18  ;;  %p744_p1 = scmp.lt.s32.totalorder %s210_s8, %s210_s8 }
  0x23   : > { %p745_p3 = scmp.lt.s32.totalorder %s736_s18, %s736_s18 }
  0x24   : > { %p739_p2 = pnand %p737_p0, %p723_p7 }
  0x25   : > { %p746_p6 = por %p745_p3, %p744_p1 }
  0x26   : > { %p740_p4 = pneg %p739_p2 }
  0x28   : > { %p747_p8 = pnand %p746_p6, %p740_p4 }
  0x2a   : > { %750 = shalt.err (!%p747_p8)
}
  0x2b   : > { %s918_s19 = smov [#allocation6]   ;;  %s751_s20 = scalar_lea.vmem %s1007_s11, 16 }
  0x2c   : > { %649 = dma.vmem_to_smem (!%p1003_p5), %s210_s8, 16, %s918_s19, [#allocation5]  }
  0x2d   : > { %p752_p9 = scmp.ne.s32.totalorder %s1007_s11, %s751_s20  ;;  %p759_p12 = scmp.lt.s32.totalorder %s1007_s11, %s1007_s11 }
  0x2e   : > { %p760_p13 = scmp.lt.s32.totalorder %s751_s20, %s751_s20 }
  0x2f   : > { %p754_p10 = pnand %p752_p9, %p723_p7 }
  0x30   : > { %p761_p1 = por %p760_p13, %p759_p12 }
  0x31   : > { %p755_p11 = pneg %p754_p10 }
  0x33   : > { %p762_p3 = pnand %p761_p1, %p755_p11 }
  0x35   : > { %765 = shalt.err (!%p762_p3)
}
  0x36   : > { %s919_s25 = smov [#allocation9]   ;;  %s766_s26 = scalar_lea.vmem %s1012_s15, 16 }
  0x37   : > { %655 = dma.vmem_to_smem (!%p1003_p5), %s1007_s11, 16, %s919_s25, [#allocation8]  }
  0x38   : > { %p767_p0 = scmp.ne.s32.totalorder %s1012_s15, %s766_s26  ;;  %p774_p6 = scmp.lt.s32.totalorder %s1012_s15, %s1012_s15 }
  0x39   : > { %p775_p8 = scmp.lt.s32.totalorder %s766_s26, %s766_s26 }
  0x3a   : > { %p769_p2 = pnand %p767_p0, %p723_p7 }
  0x3b   : > { %p776_p9 = por %p775_p8, %p774_p6 }
  0x3c   : > { %p770_p4 = pneg %p769_p2 }
  0x3e   : > { %p777_p10 = pnand %p776_p9, %p770_p4 }
  0x40   : > { %780 = shalt.err (!%p777_p10)
}
  0x41   : > { %s920_s27 = smov [#allocation10]   ;;  %s589_s30 = sadd.s32 4294967294, %s915_s24  }
  0x42   : > { %658 = dma.vmem_to_smem (!%p1003_p5), %s1012_s15, 16, %s920_s27, [#allocation11]  }
  0x43   : > { %s1048_s7 = sadd.s32 1, %s915_s24   ;;  %s36_s9 = sadd.s32 1, %s911_s23 }
  0x44   : > { %s33_s8 = ssub.s32 %s915_s24, %s1048_s7  ;;  %p43_p11 = scmp.ne.s32.totalorder %s911_s23, %s907_s22 }
  0x45   : > { %p34_p7 = scmp.eq.s32.totalorder %s33_s8, 0  ;;  %p44_p12 = scmp.eq.s32.totalorder %s915_s24, 0 }
  0x46   : > { %p49_p13 = scmp.ne.s32.totalorder %s907_s22, %s903_s21  ;;  %p1230_p3 = scmp.eq.s32.totalorder %s984_s28, 0 }
  0x47   : > { %s1059_s10 = scalar_select %p34_p7, %s911_s23, %s36_s9  }
  0x48   : > { %p1061_p1 = por %p44_p12, %p43_p11  ;;  %p1067_p5 = por %p1230_p3, %p49_p13 }
  0x49   : > { %p157_p0 = scmp.eq.s32.totalorder %s984_s28, 3  ;;  %p163_p2 = scmp.eq.s32.totalorder %s589_s30, 3 }
  0x4a   : > { %s1231_s12 = scalar_select %p1067_p5, 1, 0 }
  0x4b   : > { %p674_p4 = scmp.lt.s32.totalorder %s915_s24, 4  ;;  %s253_s13 = sand.u32 1, %s911_s23  }
  0x4c   : > { %p1074_p6 = por %p157_p0, %p43_p11  ;;  %p1078_p8 = por %p163_p2, %p49_p13 }
  0x4d   : > { %s596_s16 = sshll.u32 %s253_s13, 2  ;;  %s614_s17 = sshll.u32 %s915_s24, 6 }
  0x4e   : > { %s1232_s14 = scalar_select %p1074_p6, 1, 0 }
  0x4f   : > { %s1233_s15 = scalar_select %p1078_p8, 1, 0 }
  0x50   : > { %s1086_s20 = scalar_lea.hbm %s1214_s0, %s614_s17  ;;  %s257_s25 = scalar_lea.vmem [#allocation2], %s596_s16 }
  0x51   : > { %s265_s26 = sshll.u32 %s257_s25, 4  ;;  %p1090_p9 = pnand %p674_p4, %p1061_p1  ;;  %s266_s26 = int_to_ptr.vmem [resolvable:$true] %s265_s26 }
  0x52   : > { %s254_s30 = scalar_lea.sflag [#allocation3], %s253_s13  ;;  %s781_s8 = scalar_lea.hbm %s1086_s20, 64 }
  0x53   : > { %p782_p10 = scmp.ne.s32.totalorder %s1086_s20, %s781_s8  ;;  %p783_p7 = pneg %p1090_p9 }
  0x54   : > { %s786_s18 = scalar_lea.hbm %s1214_s0, 256  ;;  %p787_p13 = scmp.lt.s32.totalorder %s1086_s20, %s1214_s0 }
  0x55   : > { %p784_p11 = pnand %p783_p7, %p782_p10  ;;  %p788_p1 = scmp.lt.s32.totalorder %s786_s18, %s781_s8 }
  0x57   : > { %p785_p12 = pneg %p784_p11  ;;  %p789_p3 = por %p788_p1, %p787_p13 }
  0x59   : > { %p790_p0 = pnand %p789_p3, %p785_p12 }
  0x5b   : > { %793 = shalt.err (!%p790_p0)
}
  0x5c   : > { %s794_s11 = scalar_lea.vmem %s266_s26, 64  ;;  %s921_s13 = smov [#allocation2]  }
  0x5d   : > { %p795_p2 = scmp.ne.s32.totalorder %s266_s26, %s794_s11  ;;  %s799_s25 = sshll.u32 %s921_s13, 4  ;;  %s800_s25 = int_to_ptr.vmem [resolvable:$false] %s799_s25 }
  0x5e   : > { %s801_s1 = scalar_lea.vmem %s800_s25, 128  ;;  %p802_p10 = scmp.lt.s32.totalorder %s266_s26, %s800_s25 }
  0x5f   : > { %p797_p4 = pnand %p795_p2, %p783_p7  ;;  %p803_p11 = scmp.lt.s32.totalorder %s801_s1, %s794_s11 }
  0x61   : > { %p798_p8 = pneg %p797_p4  ;;  %p804_p6 = por %p803_p11, %p802_p10 }
  0x63   : > { %p805_p5 = pnand %p804_p6, %p798_p8 }
  0x65   : > { %808 = shalt.err (!%p805_p5)
}
  0x66   : > { %662 = dma.hbm_to_vmem [thread:$0]  (!%p1090_p9), %s1086_s20, 64, %s266_s26, %s254_s30  }
  0x67   : > { %p1235_p12 = scmp.ne.s32.totalorder %s1226_s29, 0 }
  0x68   : > { %s1111_s8 = sand.u32 (!%p1235_p12), 1, %s907_s22   ;;  %p1236_p6 = scmp.ne.s32.totalorder (!%p1235_p12), %s1231_s12, 0 }
  0x69   : > { %274 = sbr.rel (%p1235_p12) target bundleno = 709 (0x2c5), region = 40  ;;  %s600_s9 = sshll.u32 (!%p1235_p12), %s1111_s8, 2 }
  0x6a   : > { %s277_s17 = scalar_lea.sflag (!%p1235_p12), [#allocation3], %s1111_s8  ;;  %s280_s1 = scalar_lea.vmem (!%p1235_p12), [#allocation2], %s600_s9 }
  0x6e   : > { %878 = dma.done.wait (%p1236_p6), %s277_s17, 64  }
  0x6f   : > { %880 = vsyncadd (%p1236_p6), %s277_s17, 4294967232  ;;  %p1237_p5 = scmp.eq.s32.totalorder %s984_s28, 0 }
  0x71   : > { %882 = dma.done.wait (%p1237_p5), [#allocation5], 16   ;;  %p1238_p8 = pmov %p1237_p5 }
  0x72   : > { %p1239_p9 = pmov %p1237_p5 }
  0x73   : > { %884 = vsyncadd (%p1238_p8), [#allocation5], 4294967280 }
  0x74   : > { %886 = dma.done.wait (%p1239_p9), [#allocation8], 32   ;;  %p1240_p7 = pmov %p1237_p5 }
  0x75   : > { %p1241_p13 = pmov %p1237_p5 }
  0x76   : > { %888 = vsyncadd (%p1240_p7), [#allocation8], 4294967264 }
  0x77   : > { %890 = dma.done.wait (%p1241_p13), [#allocation11], 16   ;;  %p1242_p1 = pmov %p1237_p5 }
  0x79   : > { %892 = vsyncadd (%p1242_p1), [#allocation11], 4294967280 }
  0x7a   : > { %301 = sfence }
  0x7b   : > { %v338_v0 = vlaneseq  ;;  %v922_v1 = vmov 1983009808   ;;  %v333_v5 = vld [vmem:[%s280_s1] sm:$0xf]  ;;  %vm345_vm0 = vcmask 1041408   ;;  %s606_s30 = sshll.u32 %s1111_s8, 3 }
  0x7c   : > { %v336_v2 = vunpack.c.l.s4 %v922_v1  ;;  %s611_s18 = sshll.u32 %s984_s28, 7  ;;  %s330_s16 = scalar_lea.vmem [#allocation13], %s606_s30 }
  0x7d   : > { %v1133_v3 = vshrl.u32 %v338_v0, 7  ;;  %s446_s19 = sshll.u32 %s330_s16, 4  ;;  %s1150_s17 = scalar_lea.hbm %s1220_s6, %s611_s18  ;;  %s1152_s19 = int_to_ptr.vmem [resolvable:$true] %s446_s19 }
  0x7e   : > { %v337_v4 = vunpack.c.0.s8 %v336_v2  ;;  %s419_s1 = scalar_lea.sflag [#allocation14], %s1111_s8  ;;  %p1243_p0 = scmp.ne.s32.totalorder %s1232_s14, 0 }
  0x7f   : > { %vm409_vm3 = vcmp.eq.s32.totalorder %v1133_v3, 0 }
  0x80   : > { %v340_v6 = vsub.s32 %v337_v4, %v1133_v3 }
  0x82   : > { %v341_v7 = vrot.slane %v333_v5, %v340_v6 }
  0x84   : > { %v342_v8 = vcombine.high %v341_v7, %v341_v7  ;;  %v346_v9 = vsel %vm345_vm0, %v341_v7, 0.0 }
  0x86   : > { %v347_v10 = vsel %vm345_vm0, %v342_v8, 0.0 }
  0x87   : > { %v348_v11 = vadd.f32 %v347_v10, %v346_v9 }
  0x89   : > { %349 = vadd.xlane.f32.xlu0 %v348_v11 }
 0x112   : > { %v350_v12 = vpop.xlane.xlu0 %349 }
 0x113   : > { %v351_v13 = vrot.slane %v350_v12, 4 }
 0x115   : > { %v352_v14 = vadd.f32 %v351_v13, %v350_v12 }
 0x117   : > { %v353_v15 = vrot.slane %v352_v14, 2 }
 0x119   : > { %v354_v16 = vadd.f32 %v353_v15, %v352_v14 }
 0x11b   : > { %v355_v17 = vrot.slane %v354_v16, 1 }
 0x11d   : > { %v356_v18 = vadd.f32 %v355_v17, %v354_v16 }
 0x11f   : > { %616 = vpush %v356_v18 }
 0x150   : > { %s617_s29 = spop %616 }
 0x151   : > { %s358_s12 = smul.f32 0.001953125, %s617_s29  ;;  %s809_s29 = scalar_lea.vmem %s1152_s19, 128 }
 0x152   : > { %p810_p3 = scmp.ne.s32.totalorder %s1152_s19, %s809_s29 }
 0x153   : > { %v359_v19 = vstv %s358_s12  ;;  %s923_s12 = smov [#allocation13]  }
 0x154   : > { %v1138_v20 = vsub.f32 %v333_v5, %v359_v19  ;;  %p811_p2 = pnand %p810_p3, %p1243_p0 }
 0x156   : > { %v361_v21 = vmul.f32 %v1138_v20, %v1138_v20  ;;  %p812_p4 = pneg %p811_p2 }
 0x158   : > { %v369_v22 = vrot.slane %v361_v21, %v340_v6 }
 0x15a   : > { %v370_v23 = vcombine.high %v369_v22, %v369_v22  ;;  %v373_v24 = vsel %vm345_vm0, %v369_v22, 0.0 }
 0x15c   : > { %v374_v25 = vsel %vm345_vm0, %v370_v23, 0.0 }
 0x15d   : > { %v375_v26 = vadd.f32 %v374_v25, %v373_v24 }
 0x15f   : > { %376 = vadd.xlane.f32.xlu0 %v375_v26 }
 0x1e8   : > { %v377_v27 = vpop.xlane.xlu0 %376 }
 0x1e9   : > { %v378_v28 = vrot.slane %v377_v27, 4 }
 0x1eb   : > { %v379_v29 = vadd.f32 %v378_v28, %v377_v27 }
 0x1ed   : > { %v380_v30 = vrot.slane %v379_v29, 2 }
 0x1ef   : > { %v381_v31 = vadd.f32 %v380_v30, %v379_v29 }
 0x1f1   : > { %v382_v32 = vrot.slane %v381_v31, 1 }
 0x1f3   : > { %v383_v33 = vadd.f32 %v382_v32, %v381_v31 }
 0x1f5   : > { %618 = vpush %v383_v33 }
 0x226   : > { %s619_s20 = spop %618 }
 0x227   : > { %s385_s26 = smul.f32 0.001953125, %s619_s20  ;;  %s813_s20 = sshll.u32 %s923_s12, 4  ;;  %s814_s20 = int_to_ptr.vmem [resolvable:$false] %s813_s20 }
 0x228   : > { %p816_p10 = scmp.lt.s32.totalorder %s1152_s19, %s814_s20 }
 0x229   : > { %s386_s27 = sadd.f32 1e-05, %s385_s26  ;;  %s815_s26 = scalar_lea.vmem %s814_s20, 256 }
 0x22a   : > { %p817_p11 = scmp.lt.s32.totalorder %s815_s26, %s809_s29 }
 0x22b   : > { %v387_v34 = vstv %s386_s27 }
 0x22c   : > { %717 = vrsqrt.f32 %v387_v34  ;;  %vm390_vm1 = vcmp.eq.f32.partialorder %v387_v34, inf  ;;  %v393_v37 = vand.u32 2147483648, %v387_v34  ;;  %vm392_vm2 = vcmp.eq.f32.partialorder %v387_v34, 0.0  ;;  %p818_p12 = por %p817_p11, %p816_p10 }
 0x22e   : > { %p819_p6 = pnand %p818_p12, %p812_p4 }
 0x239   : > { %v718_v35 = vpop.eup %717 }
 0x23a   : > { %v389_v36 = vmul.f32 %v718_v35, %v387_v34 }
 0x23c   : > { %v391_v38 = vsel %vm390_vm1, %v387_v34, %v389_v36 }
 0x23d   : > { %v394_v39 = vsel %vm392_vm2, %v393_v37, %v391_v38 }
 0x23e   : > { %620 = vpush %v394_v39 }
 0x26f   : > { %s621_s11 = spop %620 }
 0x270   : > { %v398_v40 = vstv %s621_s11 }
 0x271   : > { %719 = vrcp.f32 %v398_v40  ;;  %v411_v41 = vsel %vm409_vm3, %v359_v19, %v398_v40 }
 0x272   : > { %412 = vst [vmem:[%s330_s16] sm:$0xff] %v411_v41 }
 0x273   : > { %822 = shalt.err (!%p819_p6)
}
 0x274   : > { %s823_s27 = scalar_lea.hbm %s1150_s17, 128  ;;  %s827_s16 = scalar_lea.hbm %s1220_s6, 512 }
 0x275   : > { %p824_p5 = scmp.ne.s32.totalorder %s1150_s17, %s823_s27  ;;  %p828_p7 = scmp.lt.s32.totalorder %s1150_s17, %s1220_s6 }
 0x276   : > { %p829_p13 = scmp.lt.s32.totalorder %s827_s16, %s823_s27 }
 0x277   : > { %p825_p8 = pnand %p824_p5, %p1243_p0 }
 0x278   : > { %p830_p1 = por %p829_p13, %p828_p7 }
 0x279   : > { %p826_p9 = pneg %p825_p8 }
 0x27b   : > { %p831_p3 = pnand %p830_p1, %p826_p9 }
 0x27d   : > { %834 = shalt.err (!%p831_p3)
}
 0x27e   : > { %643 = dma.vmem_to_hbm [thread:$0]  (%p1243_p0), %s1152_s19, 128, %s1150_s17, %s419_s1   ;;  %v720_v42 = vpop.eup %719 }
 0x27f   : > { %622 = vpush %v720_v42  ;;  %s396_s25 = sld [smem:[#allocation6 + %s984_s28]]  ;;  %s615_s26 = sshll.u32 %s984_s28, 6 }
 0x280   : > { %s397_s29 = sld [smem:[#allocation7 + %s984_s28]]  ;;  %s323_s27 = scalar_lea.vmem [#allocation12], %s600_s9 }
 0x281   : > { %s433_s30 = sshll.u32 %s323_s27, 4  ;;  %s431_s19 = scalar_lea.hbm %s1219_s5, %s615_s26  ;;  %s434_s30 = int_to_ptr.vmem [resolvable:$true] %s433_s30 }
 0x282   : > { %s414_s17 = scalar_lea.sflag [#allocation4], %s1111_s8  ;;  %s835_s1 = scalar_lea.vmem %s434_s30, 64 }
 0x283   : > { %p836_p2 = scmp.ne.s32.totalorder %s434_s30, %s835_s1  ;;  %s924_s11 = smov [#allocation12]  }
 0x284   : > { %s839_s28 = sshll.u32 %s924_s11, 4  ;;  %s840_s28 = int_to_ptr.vmem [resolvable:$false] %s839_s28 }
 0x285   : > { %p837_p4 = pnand %p836_p2, %p1243_p0  ;;  %s841_s9 = scalar_lea.vmem %s840_s28, 128 }
 0x286   : > { %v404_v44 = vstv %s397_s29  ;;  %p842_p11 = scmp.lt.s32.totalorder %s434_s30, %s840_s28  ;;  %p843_p12 = scmp.lt.s32.totalorder %s841_s9, %s835_s1 }
 0x287   : > { %p838_p10 = pneg %p837_p4 }
 0x288   : > { %p844_p6 = por %p843_p12, %p842_p11 }
 0x28a   : > { %p845_p5 = pnand %p844_p6, %p838_p10 }
 0x2b0   : > { %s623_s12 = spop %622 }
 0x2b1   : > { %s401_s20 = smul.f32 %s623_s12, %s396_s25 }
 0x2b3   : > { %v402_v43 = vstv %s401_s20 }
 0x2b4   : > { %v403_v45 = vmul.f32 %v402_v43, %v1138_v20 }
 0x2b6   : > { %v405_v46 = vadd.f32 %v404_v44, %v403_v45 }
 0x2b8   : > { %406 = vst [vmem:[%s323_s27] sm:$0xf] %v405_v46 }
 0x2b9   : > { %848 = shalt.err (!%p845_p5)
}
 0x2ba   : > { %s849_s13 = scalar_lea.hbm %s431_s19, 64  ;;  %s853_s29 = scalar_lea.hbm %s1219_s5, 256 }
 0x2bb   : > { %p850_p8 = scmp.ne.s32.totalorder %s431_s19, %s849_s13  ;;  %p854_p13 = scmp.lt.s32.totalorder %s431_s19, %s1219_s5 }
 0x2bc   : > { %p855_p1 = scmp.lt.s32.totalorder %s853_s29, %s849_s13 }
 0x2bd   : > { %p851_p9 = pnand %p850_p8, %p1243_p0 }
 0x2be   : > { %p856_p3 = por %p855_p1, %p854_p13 }
 0x2bf   : > { %p852_p7 = pneg %p851_p9 }
 0x2c1   : > { %p857_p2 = pnand %p856_p3, %p852_p7 }
 0x2c3   : > { %860 = shalt.err (!%p857_p2)
}
 0x2c4   : > { %642 = dma.vmem_to_hbm [thread:$0]  (%p1243_p0), %s434_s30, 64, %s431_s19, %s414_s17  }
 0x2c5 PF: > { %p679_p4 = scmp.ge.s32.totalorder %s915_s24, 2  ;;  %s458_s26 = sand.u32 1, %s903_s21  }
 0x2c6   : > { %p1244_p10 = scmp.ne.s32.totalorder %s1233_s15, 0  ;;  %s459_s27 = scalar_lea.sflag [#allocation4], %s458_s26 }
 0x2c8   : > { %p664_p11 = pnand %p679_p4, %p1244_p10 }
 0x2ca   : > { %p665_p12 = pneg %p664_p11 }
 0x2cc   : > { %894 = dma.done.wait (%p665_p12), %s459_s27, 64  }
 0x2cd   : > { %896 = vsyncadd (%p665_p12), %s459_s27, 4294967232  ;;  %s468_s18 = scalar_lea.sflag [#allocation14], %s458_s26 }
 0x2ce   : > { %898 = dma.done.wait (%p665_p12), %s468_s18, 128  }
 0x2cf   : > { %900 = vsyncadd (%p665_p12), %s468_s18, 4294967168  ;;  %p26_p0 = scmp.ge.s32.totalorder %s1048_s7, 6   ;;  %s1245_s21 = smov %s907_s22 }
 0x2d0   : > { %s1246_s22 = smov %s911_s23  ;;  %s1247_s23 = smov %s1059_s10 }
 0x2d1   : > { %s1248_s24 = smov %s1048_s7  ;;  %28 = sbr.rel (!%p26_p0) target bundleno = 12 (0xc), region = 119 }
 0x2d6   :  { %473 = vsyncpa [#allocation3], 1 }
 0x2d7   :  { %475 = vsyncpa [#allocation3 + $0x1], 1 }
 0x2d8   :  { %476 = vsyncpa [#allocation4], 1 }
 0x2d9   :  { %478 = vsyncpa [#allocation4 + $0x1], 1 }
 0x2da   :  { %479 = vsyncpa [#allocation14], 1 }
 0x2db   :  { %481 = vsyncpa [#allocation14 + $0x1], 1 }
 0x2dc   :  { %482 = vsyncpa [#allocation5], 1 }
 0x2dd   :  { %484 = vsyncpa [#allocation5 + $0x1], 1 }
 0x2de   :  { %485 = vsyncpa [#allocation8], 1 }
 0x2df   :  { %486 = vsyncpa [#allocation11], 1 }

</bundles_post_ra>
